<compile_context>
chip_gen: v5e
topology: v5e:2x2
jax: 0.10.0
libtpu: 0.0.40
codegen_flags: <defaults>
</compile_context>

<pallas_src>
import functools
import math

import jax
import jax.numpy as jnp
from jax import lax
from jax.experimental import pallas as pl
from jax.experimental.pallas import tpu as pltpu

_INV_SQRT2 = 1.0 / math.sqrt(2.0)


def _round_up(n, m):
    return ((n + m - 1) // m) * m


def _cdiv(a, b):
    return (a + b - 1) // b


def _sublane(dtype):
    # Sublane packing: 32-bit -> 8 rows/vreg, 16-bit -> 16, 8-bit -> 32.
    return {4: 8, 2: 16, 1: 32}.get(jnp.dtype(dtype).itemsize, 8)


def _vmem_budget_bytes():
    """~85% of physical per-core VMEM (headroom for compiler scratch)."""
    cap = 64 * 1024 * 1024  # conservative default (v7x per-TC VMEM)
    try:
        info = pltpu.get_tpu_info()
        cap = int(getattr(info, "vmem_capacity_bytes", cap)) or cap
    except Exception:  # API drift / not queryable -> stay conservative
        pass
    return int(0.85 * cap)


def _mlp_kernel(x_ref, w1_ref, b1_ref, w2_ref, b2_ref, o_ref, *scratch,
                n_hid_steps):
    # grid = (row tiles ["parallel"], hidden chunks ["arbitrary" reduction])
    # x_ref : (TM, IN_p)     resident across the hidden axis (constant k-index)
    # w1_ref: (IN_p, THID)   hidden chunk k of the first weight
    # b1_ref: (1, THID)      f32
    # w2_ref: (THID, IN_p)   hidden chunk k of the second weight
    # b2_ref: (1, IN_p)      f32, resident
    # o_ref : (TM, IN_p)     row-tiled output
    # scratch: (acc_ref,) f32 (TM, IN_p) -- only allocated when n_hid_steps > 1

    # First linear (this hidden chunk): native-dtype MXU operands, f32 acc.
    h = jnp.dot(x_ref[...], w1_ref[...], preferred_element_type=jnp.float32)
    h = h + b1_ref[...]

    # Exact GELU (erf form) == torch nn.GELU(approximate='none').
    # Elementwise over hidden units, so applying it per hidden chunk is exact.
    h = 0.5 * h * (1.0 + lax.erf(h * _INV_SQRT2))

    # Dropout: identity (inference / eval mode).
    # TODO(synk): training-mode dropout via in-kernel PRNG mask.

    # Second linear (partial over this hidden chunk), f32 accumulation.
    partial = jnp.dot(h.astype(w2_ref.dtype), w2_ref[...],
                      preferred_element_type=jnp.float32)

    if n_hid_steps == 1:
        # Fully resident weights: no accumulator scratch needed.
        o_ref[...] = (partial + b2_ref[...]).astype(o_ref.dtype)
    else:
        acc_ref, = scratch
        k = pl.program_id(1)

        @pl.when(k == 0)
        def _():
            acc_ref[...] = partial

        @pl.when(k > 0)
        def _():
            acc_ref[...] = acc_ref[...] + partial

        @pl.when(k == pl.num_programs(1) - 1)
        def _():
            o_ref[...] = (acc_ref[...] + b2_ref[...]).astype(o_ref.dtype)


def mlp_forward(x, w1, b1, w2, b2, *, tile_m=None, hidden_tile=None):
    """MLP forward (eval mode): GELU(x @ w1 + b1) @ w2 + b2.

    x : (..., in_features); w1: (in, hid); b1: (hid,); w2: (hid, in); b2: (in,)
    Operands may be bf16 (recommended on v5e for MXU peak); accumulation and
    the bias/GELU epilogue are always f32.
    """
    orig_shape = x.shape
    in_features = orig_shape[-1]
    hidden = w1.shape[1]
    x2d = x.reshape(-1, in_features)
    m = x2d.shape[0]

    x_item = jnp.dtype(x.dtype).itemsize
    w_item = jnp.dtype(w1.dtype).itemsize
    sub = _sublane(x.dtype)
    budget = _vmem_budget_bytes()

    # ------------------------------------------------------------------ row tile
    if tile_m is None:
        # 128 MiB-VMEM parts (v5e/v6e) take bigger row tiles than v7x (64 MiB).
        tile_m = 512 if budget >= 96 * 1024 * 1024 else 256
    m_aligned = _round_up(m, sub)
    tm = _round_up(min(tile_m, m_aligned), sub)
    # Keep >= 2 row steps when rows allow: shards the "parallel" axis across
    # v7x's two TensorCores and gives a real software pipeline everywhere.
    if _cdiv(m_aligned, tm) < 2 and m_aligned >= 2 * sub:
        tm = _round_up(_cdiv(m_aligned, 2), sub)
    m_p = _round_up(m, tm)

    # --------------------------------------------------------- feature / hidden
    in_p = _round_up(in_features, 128)
    hid_128 = _round_up(hidden, 128)

    def _fits(thid, w_bufs):
        io = 4 * tm * in_p * x_item                     # x + out, double-buffered
        acc = tm * in_p * 4 if thid < hid_128 else 0    # f32 accumulator
        h_bytes = tm * thid * 4                         # f32 hidden intermediate
        w = w_bufs * 2 * in_p * thid * w_item           # w1 + w2 chunk
        b = w_bufs * (thid + in_p) * 4
        return io + acc + h_bytes + w + b + (2 << 20) <= budget

    if hidden_tile is not None:
        thid = _round_up(min(hidden_tile, hid_128), 128)
        hid_p = _round_up(hidden, thid)
    elif _fits(hid_128, 1):
        thid, hid_p = hid_128, hid_128                  # fully resident weights
    else:
        # Stream the hidden dimension in 256-aligned chunks (fills the 256-wide
        # MXU on v6e/v7x); pick the largest chunk that still fits with
        # double-buffered weight DMAs.
        thid = 256
        for cand in (4096, 2048, 1024, 512, 256):
            if cand <= hid_128 and _fits(cand, 2):
                thid = cand
                break
        thid = min(thid, hid_128)
        hid_p = _round_up(hidden, thid)

    n_row = m_p // tm
    n_hid = hid_p // thid
    resident_weights = (n_hid == 1)

    # -------------------------------------------------- padding (skip if aligned)
    x_p = x2d
    if m_p != m or in_p != in_features:
        x_p = jnp.pad(x2d, ((0, m_p - m), (0, in_p - in_features)))

    b1f = b1.reshape(1, -1).astype(jnp.float32)
    b2f = b2.reshape(1, -1).astype(jnp.float32)
    w1_p, b1_p, w2_p, b2_p = w1, b1f, w2, b2f
    if in_p != in_features or hid_p != hidden:
        w1_p = jnp.pad(w1, ((0, in_p - in_features), (0, hid_p - hidden)))
        b1_p = jnp.pad(b1f, ((0, 0), (0, hid_p - hidden)))
        w2_p = jnp.pad(w2, ((0, hid_p - hidden), (0, in_p - in_features)))
        b2_p = jnp.pad(b2f, ((0, 0), (0, in_p - in_features)))

    # -------------------------------------------------------------- VMEM budget
    w_bufs = 1 if resident_weights else 2
    needed = (4 * tm * in_p * x_item
              + (0 if resident_weights else tm * in_p * 4)
              + tm * thid * 4
              + w_bufs * 2 * in_p * thid * w_item
              + w_bufs * (thid + in_p) * 4)
    vmem_limit = int(min(budget, max(needed + (4 << 20), 32 * 1024 * 1024)))

    # ------------------------------------------------------------- cost estimate
    w_passes = 1 if resident_weights else n_row   # weights re-streamed per row tile
    cost = pl.CostEstimate(
        flops=4 * m_p * in_p * hid_p,
        transcendentals=m_p * hid_p,
        bytes_accessed=(2 * m_p * in_p * x_item
                        + w_passes * 2 * in_p * hid_p * w_item
                        + (hid_p + in_p) * 4),
    )

    kernel = functools.partial(_mlp_kernel, n_hid_steps=n_hid)
    scratch = [] if resident_weights else [pltpu.VMEM((tm, in_p), jnp.float32)]

    def _specs(single_buffer_weights):
        wkw = ({"pipeline_mode": pl.Buffered(1)} if single_buffer_weights else {})
        return [
            pl.BlockSpec((tm, in_p), lambda i, k: (i, 0)),            # x (rows)
            pl.BlockSpec((in_p, thid), lambda i, k: (0, k), **wkw),   # w1 chunk
            pl.BlockSpec((1, thid), lambda i, k: (0, k), **wkw),      # b1 chunk
            pl.BlockSpec((thid, in_p), lambda i, k: (k, 0), **wkw),   # w2 chunk
            pl.BlockSpec((1, in_p), lambda i, k: (0, 0), **wkw),      # b2
        ]

    def _run(single_buffer_weights):
        return pl.pallas_call(
            kernel,
            out_shape=jax.ShapeDtypeStruct((m_p, in_p), x.dtype),
            grid_spec=pltpu.PrefetchScalarGridSpec(
                num_scalar_prefetch=0,
                grid=(n_row, n_hid),
                in_specs=_specs(single_buffer_weights),
                out_specs=pl.BlockSpec((tm, in_p), lambda i, k: (i, 0)),
                scratch_shapes=scratch,
            ),
            compiler_params=pltpu.CompilerParams(
                dimension_semantics=("parallel", "arbitrary"),
                vmem_limit_bytes=vmem_limit,
            ),
            cost_estimate=cost,
        )(x_p, w1_p, b1_p, w2_p, b2_p)

    if resident_weights:
        # Constant-index weights: single-buffer them (halves weight VMEM).
        try:
            out = _run(True)
        except Exception:
            out = _run(False)   # fallback if Buffered(1) rejected by this build
    else:
        out = _run(False)

    if m_p != m or in_p != in_features:
        out = out[:m, :in_features]
    return out.reshape(orig_shape)


def init_mlp_params(key, in_features, hidden_features, dtype=jnp.float32):
    """Deterministic init mimicking nn.Linear's uniform(-1/sqrt(fan_in)) ranges.

    Weights stored as (in, out) = transpose of torch's (out, in) layout, so the
    kernel computes x @ W + b (== x @ W_torch.T + b).
    """
    k1, k2, k3, k4 = jax.random.split(key, 4)
    bound1 = 1.0 / math.sqrt(in_features)
    bound2 = 1.0 / math.sqrt(hidden_features)
    w1 = jax.random.uniform(k1, (in_features, hidden_features), dtype,
                            minval=-bound1, maxval=bound1)
    b1 = jax.random.uniform(k2, (hidden_features,), dtype,
                            minval=-bound1, maxval=bound1)
    w2 = jax.random.uniform(k3, (hidden_features, in_features), dtype,
                            minval=-bound2, maxval=bound2)
    b2 = jax.random.uniform(k4, (in_features,), dtype,
                            minval=-bound2, maxval=bound2)
    return w1, b1, w2, b2


def mlp_reference(x, w1, b1, w2, b2):
    h = x @ w1 + b1.reshape(1, -1)
    h = 0.5 * h * (1.0 + lax.erf(h * _INV_SQRT2))
    return h @ w2 + b2.reshape(1, -1)


if __name__ == "__main__":
    # Small shapes consistent with an MLP on token features:
    # batch=2, seq=8, in_features=32, hidden_features=64, drop_rate=0.0 (eval).
    batch, seq, in_features, hidden_features = 2, 8, 32, 64

    key = jax.random.PRNGKey(0)
    kx, kp = jax.random.split(key)
    x = jax.random.normal(kx, (batch, seq, in_features), dtype=jnp.float32)
    w1, b1, w2, b2 = init_mlp_params(kp, in_features, hidden_features)

    # 1) f32, resident-weight path (multi-step row grid -> pipelined DMAs).
    out = jax.block_until_ready(mlp_forward(x, w1, b1, w2, b2))
    ref = mlp_reference(x, w1, b1, w2, b2)
    assert out.shape == x.shape
    assert jnp.allclose(out, ref, atol=1e-5, rtol=1e-5), "f32 mismatch"

    # 2) bf16 operands straight to the MXU, f32 accumulate + epilogue.
    xb = x.astype(jnp.bfloat16)
    w1b, b1b = w1.astype(jnp.bfloat16), b1.astype(jnp.bfloat16)
    w2b, b2b = w2.astype(jnp.bfloat16), b2.astype(jnp.bfloat16)
    out_bf16 = jax.block_until_ready(mlp_forward(xb, w1b, b1b, w2b, b2b))
    ref_bf16 = mlp_reference(xb.astype(jnp.float32), w1b.astype(jnp.float32),
                             b1b.astype(jnp.float32), w2b.astype(jnp.float32),
                             b2b.astype(jnp.float32))
    assert out_bf16.shape == x.shape
    assert jnp.allclose(out_bf16.astype(jnp.float32), ref_bf16,
                        atol=5e-2, rtol=5e-2), "bf16 mismatch"

    # 3) Exercise the hidden-streaming / accumulator path (forced small chunk).
    hid_big = 256
    w1s, b1s, w2s, b2s = init_mlp_params(kp, in_features, hid_big)
    out_s = jax.block_until_ready(
        mlp_forward(x, w1s, b1s, w2s, b2s, hidden_tile=128))
    ref_s = mlp_reference(x, w1s, b1s, w2s, b2s)
    assert out_s.shape == x.shape
    assert jnp.allclose(out_s, ref_s, atol=1e-5, rtol=1e-5), "streaming mismatch"

    print("KERNEL_OK")
</pallas_src>

<mosaic_0001>
module attributes {stable_mosaic.version = 11 : i64} {
  func.func @_mlp_kernel(%arg0: i32, %arg1: i32, %arg2: memref<8x128xf32, #tpu.memory_space<vmem>>, %arg3: memref<128x128xf32, #tpu.memory_space<vmem>>, %arg4: memref<1x128xf32, #tpu.memory_space<vmem>>, %arg5: memref<128x128xf32, #tpu.memory_space<vmem>>, %arg6: memref<1x128xf32, #tpu.memory_space<vmem>>, %arg7: memref<8x128xf32, #tpu.memory_space<vmem>>) attributes {dimension_semantics = [#tpu.dimension_semantics<parallel>, #tpu.dimension_semantics<arbitrary>], iteration_bounds = array<i64: 2, 1>, scalar_prefetch = 0 : i64, scratch_operands = 0 : i64, tpu.core_type = #tpu.core_type<tc>, window_params = [{transform_indices = @transform_0, window_bounds = array<i64: 8, 128>}, {pipeline_mode = #tpu.pipeline_mode<synchronous>, transform_indices = @transform_1, window_bounds = array<i64: 128, 128>}, {pipeline_mode = #tpu.pipeline_mode<synchronous>, transform_indices = @transform_2, window_bounds = array<i64: 1, 128>}, {pipeline_mode = #tpu.pipeline_mode<synchronous>, transform_indices = @transform_3, window_bounds = array<i64: 128, 128>}, {pipeline_mode = #tpu.pipeline_mode<synchronous>, transform_indices = @transform_4, window_bounds = array<i64: 1, 128>}, {transform_indices = @transform_5, window_bounds = array<i64: 8, 128>}]} {
    %c0 = arith.constant 0 : index
    %c0_0 = arith.constant 0 : index
    %0 = vector.load %arg2[%c0, %c0_0] : memref<8x128xf32, #tpu.memory_space<vmem>>, vector<8x128xf32>
    %c0_1 = arith.constant 0 : index
    %c0_2 = arith.constant 0 : index
    %1 = vector.load %arg3[%c0_1, %c0_2] : memref<128x128xf32, #tpu.memory_space<vmem>>, vector<128x128xf32>
    %cst = arith.constant dense<0.000000e+00> : vector<8x128xf32>
    %2 = tpu.matmul %0, %1, %cst {dimension_numbers = #tpu.dot_dimension_numbers<[1], [0], [0], [1], [0, 0, 1, 1], [], []>} : vector<8x128xf32>, vector<128x128xf32>, vector<8x128xf32> -> vector<8x128xf32>
    %c0_3 = arith.constant 0 : index
    %c0_4 = arith.constant 0 : index
    %3 = vector.load %arg4[%c0_3, %c0_4] : memref<1x128xf32, #tpu.memory_space<vmem>>, vector<1x128xf32>
    %4 = vector.broadcast %3 : vector<1x128xf32> to vector<8x128xf32>
    %5 = arith.addf %2, %4 : vector<8x128xf32>
    %cst_5 = arith.constant 5.000000e-01 : f32
    %6 = vector.broadcast %cst_5 : f32 to vector<8x128xf32>
    %7 = arith.mulf %6, %5 : vector<8x128xf32>
    %cst_6 = arith.constant 0.707106769 : f32
    %8 = vector.broadcast %cst_6 : f32 to vector<8x128xf32>
    %9 = arith.mulf %5, %8 : vector<8x128xf32>
    %10 = math.erf %9 : vector<8x128xf32>
    %cst_7 = arith.constant 1.000000e+00 : f32
    %11 = vector.broadcast %cst_7 : f32 to vector<8x128xf32>
    %12 = arith.addf %11, %10 : vector<8x128xf32>
    %13 = arith.mulf %7, %12 : vector<8x128xf32>
    %c0_8 = arith.constant 0 : index
    %c0_9 = arith.constant 0 : index
    %14 = vector.load %arg5[%c0_8, %c0_9] : memref<128x128xf32, #tpu.memory_space<vmem>>, vector<128x128xf32>
    %cst_10 = arith.constant dense<0.000000e+00> : vector<8x128xf32>
    %15 = tpu.matmul %13, %14, %cst_10 {dimension_numbers = #tpu.dot_dimension_numbers<[1], [0], [0], [1], [0, 0, 1, 1], [], []>} : vector<8x128xf32>, vector<128x128xf32>, vector<8x128xf32> -> vector<8x128xf32>
    %c0_11 = arith.constant 0 : index
    %c0_12 = arith.constant 0 : index
    %16 = vector.load %arg6[%c0_11, %c0_12] : memref<1x128xf32, #tpu.memory_space<vmem>>, vector<1x128xf32>
    %17 = vector.broadcast %16 : vector<1x128xf32> to vector<8x128xf32>
    %18 = arith.addf %15, %17 : vector<8x128xf32>
    %c0_13 = arith.constant 0 : index
    %c0_14 = arith.constant 0 : index
    %19 = vector.load %arg7[%c0_13, %c0_14] : memref<8x128xf32, #tpu.memory_space<vmem>>, vector<8x128xf32>
    tpu.vector_store %arg7[%c0_13, %c0_14], %18 {strides = array<i32>} : memref<8x128xf32, #tpu.memory_space<vmem>>, vector<8x128xf32>,
    return
  }
  func.func @transform_0(%arg0: i32, %arg1: i32) -> (i32, i32) {
    %c0_i32 = arith.constant 0 : i32
    %c0_i32_0 = arith.constant 0 : i32
    return %arg0, %c0_i32 : i32, i32
  }
  func.func @transform_1(%arg0: i32, %arg1: i32) -> (i32, i32) {
    %c0_i32 = arith.constant 0 : i32
    %c0_i32_0 = arith.constant 0 : i32
    return %c0_i32, %arg1 : i32, i32
  }
  func.func @transform_2(%arg0: i32, %arg1: i32) -> (i32, i32) {
    %c0_i32 = arith.constant 0 : i32
    %c0_i32_0 = arith.constant 0 : i32
    return %c0_i32, %arg1 : i32, i32
  }
  func.func @transform_3(%arg0: i32, %arg1: i32) -> (i32, i32) {
    %c0_i32 = arith.constant 0 : i32
    %c0_i32_0 = arith.constant 0 : i32
    return %arg1, %c0_i32 : i32, i32
  }
  func.func @transform_4(%arg0: i32, %arg1: i32) -> (i32, i32) {
    %c0_i32 = arith.constant 0 : i32
    %c0_i32_0 = arith.constant 0 : i32
    %c0_i32_1 = arith.constant 0 : i32
    return %c0_i32, %c0_i32_0 : i32, i32
  }
  func.func @transform_5(%arg0: i32, %arg1: i32) -> (i32, i32) {
    %c0_i32 = arith.constant 0 : i32
    %c0_i32_0 = arith.constant 0 : i32
    return %arg0, %c0_i32 : i32, i32
  }
}

module attributes {stable_mosaic.version = 11 : i64} {
  func.func @_mlp_kernel(%arg0: i32, %arg1: i32, %arg2: memref<8x128xf32, #tpu.memory_space<vmem>>, %arg3: memref<128x128xf32, #tpu.memory_space<vmem>>, %arg4: memref<1x128xf32, #tpu.memory_space<vmem>>, %arg5: memref<128x128xf32, #tpu.memory_space<vmem>>, %arg6: memref<1x128xf32, #tpu.memory_space<vmem>>, %arg7: memref<8x128xf32, #tpu.memory_space<vmem>>) attributes {dimension_semantics = [#tpu.dimension_semantics<parallel>, #tpu.dimension_semantics<arbitrary>], iteration_bounds = array<i64: 2, 1>, scalar_prefetch = 0 : i64, scratch_operands = 0 : i64, tpu.core_type = #tpu.core_type<tc>, window_params = [{transform_indices = @transform_0, window_bounds = array<i64: 8, 128>}, {transform_indices = @transform_1, window_bounds = array<i64: 128, 128>}, {transform_indices = @transform_2, window_bounds = array<i64: 1, 128>}, {transform_indices = @transform_3, window_bounds = array<i64: 128, 128>}, {pipeline_mode = #tpu.pipeline_mode<synchronous>, transform_indices = @transform_4, window_bounds = array<i64: 1, 128>}, {transform_indices = @transform_5, window_bounds = array<i64: 8, 128>}]} {
    %c0 = arith.constant 0 : index
    %c0_0 = arith.constant 0 : index
    %0 = vector.load %arg2[%c0, %c0_0] : memref<8x128xf32, #tpu.memory_space<vmem>>, vector<8x128xf32>
    %c0_1 = arith.constant 0 : index
    %c0_2 = arith.constant 0 : index
    %1 = vector.load %arg3[%c0_1, %c0_2] : memref<128x128xf32, #tpu.memory_space<vmem>>, vector<128x128xf32>
    %cst = arith.constant dense<0.000000e+00> : vector<8x128xf32>
    %2 = tpu.matmul %0, %1, %cst {dimension_numbers = #tpu.dot_dimension_numbers<[1], [0], [0], [1], [0, 0, 1, 1], [], []>} : vector<8x128xf32>, vector<128x128xf32>, vector<8x128xf32> -> vector<8x128xf32>
    %c0_3 = arith.constant 0 : index
    %c0_4 = arith.constant 0 : index
    %3 = vector.load %arg4[%c0_3, %c0_4] : memref<1x128xf32, #tpu.memory_space<vmem>>, vector<1x128xf32>
    %4 = vector.broadcast %3 : vector<1x128xf32> to vector<8x128xf32>
    %5 = arith.addf %2, %4 : vector<8x128xf32>
    %cst_5 = arith.constant 5.000000e-01 : f32
    %6 = vector.broadcast %cst_5 : f32 to vector<8x128xf32>
    %7 = arith.mulf %6, %5 : vector<8x128xf32>
    %cst_6 = arith.constant 0.707106769 : f32
    %8 = vector.broadcast %cst_6 : f32 to vector<8x128xf32>
    %9 = arith.mulf %5, %8 : vector<8x128xf32>
    %10 = math.erf %9 : vector<8x128xf32>
    %cst_7 = arith.constant 1.000000e+00 : f32
    %11 = vector.broadcast %cst_7 : f32 to vector<8x128xf32>
    %12 = arith.addf %11, %10 : vector<8x128xf32>
    %13 = arith.mulf %7, %12 : vector<8x128xf32>
    %c0_8 = arith.constant 0 : index
    %c0_9 = arith.constant 0 : index
    %14 = vector.load %arg5[%c0_8, %c0_9] : memref<128x128xf32, #tpu.memory_space<vmem>>, vector<128x128xf32>
    %cst_10 = arith.constant dense<0.000000e+00> : vector<8x128xf32>
    %15 = tpu.matmul %13, %14, %cst_10 {dimension_numbers = #tpu.dot_dimension_numbers<[1], [0], [0], [1], [0, 0, 1, 1], [], []>} : vector<8x128xf32>, vector<128x128xf32>, vector<8x128xf32> -> vector<8x128xf32>
    %c0_11 = arith.constant 0 : index
    %c0_12 = arith.constant 0 : index
    %16 = vector.load %arg6[%c0_11, %c0_12] : memref<1x128xf32, #tpu.memory_space<vmem>>, vector<1x128xf32>
    %17 = vector.broadcast %16 : vector<1x128xf32> to vector<8x128xf32>
    %18 = arith.addf %15, %17 : vector<8x128xf32>
    %c0_13 = arith.constant 0 : index
    %c0_14 = arith.constant 0 : index
    %19 = vector.load %arg7[%c0_13, %c0_14] : memref<8x128xf32, #tpu.memory_space<vmem>>, vector<8x128xf32>
    tpu.vector_store %arg7[%c0_13, %c0_14], %18 {strides = array<i32>} : memref<8x128xf32, #tpu.memory_space<vmem>>, vector<8x128xf32>,
    return
  }
  func.func @transform_0(%arg0: i32, %arg1: i32) -> (i32, i32) {
    %c0_i32 = arith.constant 0 : i32
    %c0_i32_0 = arith.constant 0 : i32
    return %arg0, %c0_i32 : i32, i32
  }
  func.func @transform_1(%arg0: i32, %arg1: i32) -> (i32, i32) {
    %c0_i32 = arith.constant 0 : i32
    %c0_i32_0 = arith.constant 0 : i32
    return %c0_i32, %arg1 : i32, i32
  }
  func.func @transform_2(%arg0: i32, %arg1: i32) -> (i32, i32) {
    %c0_i32 = arith.constant 0 : i32
    %c0_i32_0 = arith.constant 0 : i32
    return %c0_i32, %arg1 : i32, i32
  }
  func.func @transform_3(%arg0: i32, %arg1: i32) -> (i32, i32) {
    %c0_i32 = arith.constant 0 : i32
    %c0_i32_0 = arith.constant 0 : i32
    return %arg1, %c0_i32 : i32, i32
  }
  func.func @transform_4(%arg0: i32, %arg1: i32) -> (i32, i32) {
    %c0_i32 = arith.constant 0 : i32
    %c0_i32_0 = arith.constant 0 : i32
    %c0_i32_1 = arith.constant 0 : i32
    return %c0_i32, %c0_i32_0 : i32, i32
  }
  func.func @transform_5(%arg0: i32, %arg1: i32) -> (i32, i32) {
    %c0_i32 = arith.constant 0 : i32
    %c0_i32_0 = arith.constant 0 : i32
    return %arg0, %c0_i32 : i32, i32
  }
}

</mosaic_0001>

<bundles_post_ra>
// kernel: tpu_custom_call.1
= control target key start
LH: loop header
LB: loop body
LE: loop exit
PB: predicated region body
PF: predicated region fallthrough
CT: control target
= control target key end

     0   :  { %10 = vsyncpa [#allocation3], 0  ;;  %s1049_s0 = inlined_call_operand.hbm [shape: f32[16,128], index: 0, kind: input, shape index: {}]   ;;  %s1050_s1 = inlined_call_operand.hbm [shape: f32[128,128], index: 1, kind: input, shape index: {}]   ;;  %s1051_s2 = inlined_call_operand.vmem [shape: f32[1,128], index: 2, kind: input, shape index: {}]   ;;  %s1052_s3 = inlined_call_operand.hbm [shape: f32[128,128], index: 3, kind: input, shape index: {}]   ;;  %s1053_s4 = inlined_call_operand.vmem [shape: f32[1,128], index: 4, kind: input, shape index: {}]   ;;  %s1054_s5 = inlined_call_operand.hbm [shape: f32[16,128], index: 5, kind: output, shape index: {}]  }
   0x1   :  { %12 = vsyncpa [#allocation3 + $0x1], 0 }
   0x2   :  { %13 = vsyncpa [#allocation6], 0 }
   0x3   :  { %14 = vsyncpa [#allocation4], 0 }
   0x4   :  { %16 = vsyncpa [#allocation4 + $0x1], 0  ;;  %s892_s18 = smov 0   ;;  %s894_s19 = smov 0  }
   0x5   :  { %s896_s20 = smov 0   ;;  %s898_s21 = smov 0  }
   0x6   :  { %s900_s22 = smov 0   ;;  %s902_s23 = smov 0  }
   0x7 LB: > { %s572_s24 = sadd.s32 4294967295, %s856_s23   ;;  %p574_p0 = scmp.ge.s32.totalorder %s856_s23, 1  ;;  %s856_s23 = sphi %s902_s23, %s22_s23   ;;  %s852_s22 = sphi %s900_s22, %s1064_s22   ;;  %s848_s21 = sphi %s898_s21, %s1063_s21   ;;  %s844_s20 = sphi %s896_s20, %s1062_s20   ;;  %s840_s19 = sphi %s894_s19, %s1061_s19   ;;  %s836_s18 = sphi %s892_s18, %s1060_s18  }
   0x8   : > { %p926_p1 = scmp.eq.s32.totalorder %s572_s24, 0  ;;  %p190_p2 = scmp.lt.s32.totalorder %s856_s23, 3 }
   0x9   : > { %s203_s28 = sshll.u32 %s1050_s1, 4  ;;  %s858_s30 = smov [#allocation5]   ;;  %s204_s28 = int_to_ptr.hbm [resolvable:$true] %s203_s28 }
   0xa   : > { %p934_p3 = pnand %p574_p0, %p190_p2  ;;  %s205_s6 = sshll.u32 %s858_s30, 4  ;;  %s206_s6 = int_to_ptr.vmem [resolvable:$true] %s205_s6 }
   0xb   : > { %p578_p6 = scmp.ge.s32.totalorder %s856_s23, 2  ;;  %s226_s9 = sshll.u32 %s1052_s3, 4  ;;  %s227_s9 = int_to_ptr.hbm [resolvable:$true] %s226_s9 }
   0xc   : > { %p603_p4 = pneg %p934_p3  ;;  %s859_s10 = smov 128  }
   0xd   : > { %s860_s11 = smov 8   ;;  %s861_s12 = smov [#allocation7]  }
   0xe   : > { %p604_p5 = pnand %p603_p4, %p926_p1  ;;  %s228_s13 = sshll.u32 %s861_s12, 4  ;;  %s229_s13 = int_to_ptr.vmem [resolvable:$true] %s228_s13 }
   0xf   : > { %s34_s14 = sadd.s32 1, %s852_s22  ;;  %s573_s15 = sadd.s32 4294967294, %s856_s23  }
  0x10   : > { %606 = dma.hbm_to_vmem [thread:$0]  (!%p604_p5), %s204_s28, 2048, %s206_s6, [#allocation6], %s859_s10, %s859_s10, %s860_s11  }
  0x11   : > { %609 = dma.hbm_to_vmem [thread:$0]  (!%p604_p5), %s227_s9, 2048, %s229_s13, [#allocation6], %s859_s10, %s859_s10, %s860_s11  }
  0x12   : > { %p36_p7 = scmp.ge.s32.totalorder %s34_s14, 2  ;;  %s41_s16 = sadd.s32 1, %s844_s20 }
  0x13   : > { %p48_p8 = scmp.ne.s32.totalorder %s844_s20, %s840_s19  ;;  %p49_p9 = scmp.eq.s32.totalorder %s856_s23, 0 }
  0x14   : > { %s1066_s14 = smov (%p36_p7, %s34_s14), 0  ;;  %p54_p10 = scmp.ne.s32.totalorder %s840_s19, %s836_s18 }
  0x15   : > { %s38_s17 = ssub.s32 %s852_s22, %s1066_s14  ;;  %p177_p11 = scmp.eq.s32.totalorder %s572_s24, 1 }
  0x16   : > { %p39_p12 = scmp.eq.s32.totalorder %s38_s17, 0  ;;  %p962_p13 = por %p926_p1, %p54_p10 }
  0x17   : > { %p966_p0 = por %p177_p11, %p48_p8  ;;  %p183_p2 = scmp.eq.s32.totalorder %s573_s15, 1 }
  0x18   : > { %s971_s28 = scalar_select %p39_p12, %s844_s20, %s41_s16  }
  0x19   : > { %p50_p4 = por %p49_p9, %p48_p8  ;;  %p973_p5 = por %p183_p2, %p54_p10 }
  0x1a   : > { %s245_s6 = sand.u32 1, %s844_s20   ;;  %s580_s24 = sshll.u32 %s852_s22, 3 }
  0x1b   : > { %p620_p7 = scmp.lt.s32.totalorder %s856_s23, 2  ;;  %s579_s7 = sshll.u32 %s245_s6, 3 }
  0x1c   : > { %s253_s10 = scalar_lea.hbm %s1049_s0, %s580_s24  ;;  %s249_s12 = scalar_lea.vmem [#allocation2], %s579_s7 }
  0x1d   : > { %s255_s11 = sshll.u32 %s253_s10, 4  ;;  %s257_s13 = sshll.u32 %s249_s12, 4  ;;  %s256_s11 = int_to_ptr.hbm [resolvable:$true] %s255_s11  ;;  %s258_s13 = int_to_ptr.vmem [resolvable:$true] %s257_s13 }
  0x1e   : > { %p611_p11 = pnand %p620_p7, %p50_p4  ;;  %s246_s15 = scalar_lea.sflag [#allocation3], %s245_s6 }
  0x1f   : > { %266 = sbr.rel (%p934_p3) target bundleno = 381 (0x17d), region = 40  ;;  %s986_s16 = sand.u32 (!%p934_p3), 1, %s840_s19  }
  0x20   : > { %613 = dma.hbm_to_vmem [thread:$0]  (!%p611_p11), %s256_s11, 128, %s258_s13, %s246_s15  }
  0x21   : > { %s582_s17 = sshll.u32 (!%p934_p3), %s986_s16, 3  ;;  %s269_s24 = scalar_lea.sflag (!%p934_p3), [#allocation3], %s986_s16 }
  0x22   : > { %s992_s7 = scalar_lea.vmem (!%p934_p3), [#allocation2], %s582_s17 }
  0x24   : > { %823 = dma.done.wait (%p962_p13), %s269_s24, 128  }
  0x25   : > { %825 = vsyncadd (%p962_p13), %s269_s24, 4294967168 }
  0x26   : > { %827 = dma.done.wait (%p926_p1), [#allocation6], 4096  }
  0x27   : > { %829 = vsyncadd (%p926_p1), [#allocation6], 4294963200  ;;  %v333_v0 = vld [vmem:[#allocation5 + $0x78] sm:$0xff]  ;;  %v332_v1 = vld [vmem:[#allocation5 + $0x70] sm:$0xff]  ;;  %s588_s26 = sshll.u32 %s848_s21, 3  ;;  %s312_s12 = scalar_lea.vmem [#allocation8], %s582_s17 }
  0x28   : > { %338 = vmatpush.msra.mxu0 %v333_v0  ;;  %v331_v2 = vld [vmem:[#allocation5 + $0x68] sm:$0xff]  ;;  %v330_v3 = vld [vmem:[#allocation5 + $0x60] sm:$0xff]  ;;  %v329_v4 = vld [vmem:[#allocation5 + $0x58] sm:$0xff]  ;;  %s454_s9 = scalar_lea.hbm %s1054_s5, %s588_s26  ;;  %s456_s13 = sshll.u32 %s312_s12, 4  ;;  %s457_s13 = int_to_ptr.vmem [resolvable:$true] %s456_s13 }
  0x29   : > { %v328_v5 = vld [vmem:[#allocation5 + $0x50] sm:$0xff]  ;;  %v327_v6 = vld [vmem:[#allocation5 + $0x48] sm:$0xff]  ;;  %v326_v7 = vld [vmem:[#allocation5 + $0x40] sm:$0xff]  ;;  %s458_s15 = sshll.u32 %s454_s9, 4  ;;  %s444_s24 = scalar_lea.sflag [#allocation4], %s986_s16  ;;  %s459_s15 = int_to_ptr.hbm [resolvable:$true] %s458_s15 }
  0x2a   : > { %339 = vmatpush.msra.mxu0 %v332_v1  ;;  %v325_v8 = vld [vmem:[#allocation5 + $0x38] sm:$0xff]  ;;  %v324_v9 = vld [vmem:[#allocation5 + $0x30] sm:$0xff]  ;;  %v323_v10 = vld [vmem:[#allocation5 + $0x28] sm:$0xff]  ;;  %s784_s21 = sshra.s32 %s459_s15, 4  ;;  %s790_s26 = scalar_lea.hbm %s1054_s5, 16  ;;  %s785_s21 = int_to_ptr.hbm [resolvable:$true] %s784_s21 }
  0x2b   : > { %v322_v11 = vld [vmem:[#allocation5 + $0x20] sm:$0xff]  ;;  %v321_v12 = vld [vmem:[#allocation5 + $0x18] sm:$0xff]  ;;  %v320_v13 = vld [vmem:[#allocation5 + $0x10] sm:$0xff]  ;;  %p791_p9 = scmp.lt.s32.totalorder %s785_s21, %s1054_s5 }
  0x2c   : > { %340 = vmatpush.msra.mxu0 %v331_v2  ;;  %v319_v14 = vld [vmem:[#allocation5 + $0x8] sm:$0xff]  ;;  %v318_v15 = vld [vmem:[#allocation5] sm:$0xff]  ;;  %v317_v16 = vld [vmem:[%s992_s7] sm:$0xff]  ;;  %s786_s7 = scalar_lea.hbm %s785_s21, 8 }
  0x2d   : > { %v417_v17 = vld [vmem:[#allocation7 + $0x78] sm:$0xff]  ;;  %v416_v18 = vld [vmem:[#allocation7 + $0x70] sm:$0xff]  ;;  %v415_v19 = vld [vmem:[#allocation7 + $0x68] sm:$0xff]  ;;  %p787_p1 = scmp.ne.s32.totalorder %s785_s21, %s786_s7  ;;  %p792_p10 = scmp.lt.s32.totalorder %s790_s26, %s786_s7 }
  0x2e   : > { %341 = vmatpush.msra.mxu0 %v330_v3  ;;  %422 = vmatpush.msra.mxu1 %v417_v17  ;;  %v414_v20 = vld [vmem:[#allocation7 + $0x60] sm:$0xff]  ;;  %v676_v21 = vld [vmem:[%s1051_s2] ss:$0 sm:$0xff]  ;;  %v413_v22 = vld [vmem:[#allocation7 + $0x58] sm:$0xff] }
  0x2f   : > { %v412_v23 = vld [vmem:[#allocation7 + $0x50] sm:$0xff]  ;;  %v411_v25 = vld [vmem:[#allocation7 + $0x48] sm:$0xff]  ;;  %v410_v27 = vld [vmem:[#allocation7 + $0x40] sm:$0xff]  ;;  %p788_p3 = pnand %p787_p1, %p966_p0  ;;  %p793_p12 = por %p792_p10, %p791_p9 }
  0x30   : > { %342 = vmatpush.msra.mxu0 %v329_v4  ;;  %423 = vmatpush.msra.mxu1 %v416_v18  ;;  %v409_v29 = vld [vmem:[#allocation7 + $0x38] sm:$0xff]  ;;  %v408_v31 = vld [vmem:[#allocation7 + $0x30] sm:$0xff]  ;;  %v407_v33 = vld [vmem:[#allocation7 + $0x28] sm:$0xff] }
  0x31   : > { %v406_v36 = vld [vmem:[#allocation7 + $0x20] sm:$0xff]  ;;  %v405_v39 = vld [vmem:[#allocation7 + $0x18] sm:$0xff]  ;;  %v404_v42 = vld [vmem:[#allocation7 + $0x10] sm:$0xff]  ;;  %p789_p8 = pneg %p788_p3 }
  0x32   : > { %343 = vmatpush.msra.mxu0 %v328_v5  ;;  %424 = vmatpush.msra.mxu1 %v415_v19  ;;  %v403_v45 = vld [vmem:[#allocation7 + $0x8] sm:$0xff]  ;;  %v402_v47 = vld [vmem:[#allocation7] sm:$0xff] }
  0x33   : > { %p794_p13 = pnand %p793_p12, %p789_p8 }
  0x34   : > { %344 = vmatpush.msra.mxu0 %v327_v6  ;;  %425 = vmatpush.msra.mxu1 %v414_v20 }
  0x36   : > { %345 = vmatpush.msra.mxu0 %v326_v7  ;;  %426 = vmatpush.msra.mxu1 %v413_v22 }
  0x38   : > { %346 = vmatpush.msra.mxu0 %v325_v8  ;;  %427 = vmatpush.msra.mxu1 %v412_v23 }
  0x3a   : > { %347 = vmatpush.msra.mxu0 %v324_v9  ;;  %428 = vmatpush.msra.mxu1 %v411_v25 }
  0x3c   : > { %348 = vmatpush.msra.mxu0 %v323_v10  ;;  %429 = vmatpush.msra.mxu1 %v410_v27 }
  0x3e   : > { %349 = vmatpush.msra.mxu0 %v322_v11  ;;  %430 = vmatpush.msra.mxu1 %v409_v29  ;;  %v677_v11 = vld [vmem:[%s1053_s4] ss:$0 sm:$0xff] }
  0x40   : > { %350 = vmatpush.msra.mxu0 %v321_v12  ;;  %431 = vmatpush.msra.mxu1 %v408_v31 }
  0x42   : > { %351 = vmatpush.msra.mxu0 %v320_v13  ;;  %432 = vmatpush.msra.mxu1 %v407_v33 }
  0x44   : > { %352 = vmatpush.msra.mxu0 %v319_v14  ;;  %433 = vmatpush.msra.mxu1 %v406_v36 }
  0x46   : > { %353 = vmatpush.msra.mxu0 %v318_v15  ;;  %434 = vmatpush.msra.mxu1 %v405_v39 }
  0x47   : > { %354 = vmatmul.f32.vlgmr.msra.gmra.mxu0 %v317_v16 }
  0x48   : > { %435 = vmatpush.msra.mxu1 %v404_v42 }
  0x4a   : > { %436 = vmatpush.msra.mxu1 %v403_v45 }
  0x4c   : > { %437 = vmatpush.msra.mxu1 %v402_v47 }
  0xc4   : > { %v355_v24 = vpop.f32.mrf.mxu0 }
  0xc5   : > { %v356_v26 = vadd.f32 %v676_v21, %v355_v24 }
  0xc7   : > { %v359_v28 = vmul.f32 0.70710677, %v356_v26  ;;  %v358_v8 = vmul.f32 0.5, %v356_v26 }
  0xc9   : > { %v360_v30 = vmul.f32 %v359_v28, %v359_v28 }
  0xcb   : > { %v361_v32 = vmin.f32 %v360_v30, 16.0 }
  0xcd   : > { %v362_v34 = vmul.f32 2.1237322e-06, %v361_v32  ;;  %v373_v35 = vmul.f32 3.8918573e-05, %v361_v32 }
  0xcf   : > { %v363_v37 = vadd.f32 0.00028619796, %v362_v34  ;;  %v374_v38 = vadd.f32 0.001143296, %v373_v35 }
  0xd1   : > { %v364_v40 = vmul.f32 %v363_v37, %v361_v32  ;;  %v375_v41 = vmul.f32 %v374_v38, %v361_v32 }
  0xd3   : > { %v376_v43 = vadd.f32 0.014752088, %v375_v41  ;;  %v365_v44 = vadd.f32 0.0036580483, %v364_v40 }
  0xd5   : > { %v377_v46 = vmul.f32 %v376_v43, %v361_v32  ;;  %v366_v49 = vmul.f32 %v365_v44, %v361_v32 }
  0xd7   : > { %v378_v48 = vadd.f32 0.112945676, %v377_v46  ;;  %v367_v52 = vadd.f32 0.05243302, %v366_v49 }
  0xd9   : > { %v379_v50 = vmul.f32 %v378_v48, %v361_v32  ;;  %v368_v55 = vmul.f32 %v367_v52, %v361_v32 }
  0xdb   : > { %v380_v51 = vadd.f32 0.4994258, %v379_v50  ;;  %v369_v56 = vadd.f32 0.18741608, %v368_v55 }
  0xdd   : > { %v381_v53 = vmul.f32 %v380_v51, %v361_v32  ;;  %v370_v58 = vmul.f32 %v369_v56, %v361_v32 }
  0xdf   : > { %v382_v54 = vadd.f32 1.0, %v381_v53  ;;  %v371_v62 = vadd.f32 1.1283791, %v370_v58 }
  0xe1   : > { %678 = vrcp.f32 %v382_v54  ;;  %v394_v61 = vand.u32 2147483648, %v382_v54  ;;  %v392_v0 = vand.u32 2147483647, %v382_v54  ;;  %vm388_vm1 = vweird.f32 %v382_v54 }
  0xe2   : > { %v372_v3 = vmul.f32 %v371_v62, %v359_v28 }
  0xe3   : > { %v395_v2 = vor.u32 1.1754944e-38, %v394_v61  ;;  %vm393_vm3 = vcmp.eq.f32.partialorder %v392_v0, 8.507059e+37 }
  0xe7   : > { %v679_v57 = vpop.eup %678 }
  0xe8   : > { %v384_v59 = vmul.f32 %v679_v57, %v382_v54  ;;  %vm389_vm0 = vweird.f32 %v679_v57 }
  0xe9   : > { %vm390_vm2 = vmor %vm388_vm1, %vm389_vm0 }
  0xea   : > { %v385_v60 = vsub.f32 1.0, %v384_v59 }
  0xec   : > { %v386_v63 = vmul.f32 %v679_v57, %v385_v60 }
  0xee   : > { %v387_v1 = vadd.f32 %v679_v57, %v386_v63 }
  0xf0   : > { %v391_v4 = vsel %vm390_vm2, %v679_v57, %v387_v1 }
  0xf1   : > { %v396_v5 = vsel %vm393_vm3, %v395_v2, %v391_v4 }
  0xf2   : > { %v397_v6 = vmul.f32 %v396_v5, %v372_v3 }
  0xf4   : > { %v586_v7 = vclamps-f32 %v397_v6, 1.0 }
  0xf6   : > { %v400_v9 = vadd.f32 1.0, %v586_v7 }
  0xf8   : > { %v401_v10 = vmul.f32 %v400_v9, %v358_v8 }
  0xfa   : > { %438 = vmatmul.f32.vlgmr.msra.gmra.mxu1 %v401_v10 }
 0x177   : > { %v439_v12 = vpop.f32.mrf.mxu1 }
 0x178   : > { %v440_v13 = vadd.f32 %v677_v11, %v439_v12 }
 0x17a   : > { %442 = vst [vmem:[%s312_s12] sm:$0xff] %v440_v13 }
 0x17b   : > { %797 = shalt.err (!%p794_p13)
}
 0x17c   : > { %601 = dma.vmem_to_hbm [thread:$0]  (%p966_p0), %s457_s13, 128, %s459_s15, %s444_s24  }
 0x17d PF: > { %s470_s16 = sand.u32 1, %s836_s18   ;;  %p615_p2 = pnand %p578_p6, %p973_p5 }
 0x17e   : > { %s471_s8 = scalar_lea.sflag [#allocation4], %s470_s16 }
 0x17f   : > { %p616_p4 = pneg %p615_p2 }
 0x181   : > { %831 = dma.done.wait (%p616_p4), %s471_s8, 128  }
 0x182   : > { %833 = vsyncadd (%p616_p4), %s471_s8, 4294967168  ;;  %s22_s23 = sadd.s32 1, %s856_s23   ;;  %s1060_s18 = smov %s840_s19 }
 0x183   : > { %p19_p7 = scmp.ge.s32.totalorder %s22_s23, 4   ;;  %s1061_s19 = smov %s844_s20 }
 0x184   : > { %s1062_s20 = smov %s971_s28  ;;  %s1063_s21 = smov %s852_s22 }
 0x185   : > { %s1064_s22 = smov %s1066_s14  ;;  %21 = sbr.rel (!%p19_p7) target bundleno = 7 (0x7), region = 98 }
 0x18a   :  { %477 = vsyncpa [#allocation3], 1 }
 0x18b   :  { %479 = vsyncpa [#allocation3 + $0x1], 1 }
 0x18c   :  { %480 = vsyncpa [#allocation6], 1 }
 0x18d   :  { %481 = vsyncpa [#allocation4], 1 }
 0x18e   :  { %483 = vsyncpa [#allocation4 + $0x1], 1 }

// kernel: tpu_custom_call.1
= control target key start
LH: loop header
LB: loop body
LE: loop exit
PB: predicated region body
PF: predicated region fallthrough
CT: control target
= control target key end

     0   :  { %10 = vsyncpa [#allocation3], 0  ;;  %s1049_s0 = inlined_call_operand.hbm [shape: f32[16,128], index: 0, kind: input, shape index: {}]   ;;  %s1050_s1 = inlined_call_operand.hbm [shape: f32[128,128], index: 1, kind: input, shape index: {}]   ;;  %s1051_s2 = inlined_call_operand.vmem [shape: f32[1,128], index: 2, kind: input, shape index: {}]   ;;  %s1052_s3 = inlined_call_operand.hbm [shape: f32[128,128], index: 3, kind: input, shape index: {}]   ;;  %s1053_s4 = inlined_call_operand.vmem [shape: f32[1,128], index: 4, kind: input, shape index: {}]   ;;  %s1054_s5 = inlined_call_operand.hbm [shape: f32[16,128], index: 5, kind: output, shape index: {}]  }
   0x1   :  { %12 = vsyncpa [#allocation3 + $0x1], 0 }
   0x2   :  { %13 = vsyncpa [#allocation6], 0 }
   0x3   :  { %14 = vsyncpa [#allocation4], 0 }
   0x4   :  { %16 = vsyncpa [#allocation4 + $0x1], 0  ;;  %s892_s18 = smov 0   ;;  %s894_s19 = smov 0  }
   0x5   :  { %s896_s20 = smov 0   ;;  %s898_s21 = smov 0  }
   0x6   :  { %s900_s22 = smov 0   ;;  %s902_s23 = smov 0  }
   0x7 LB: > { %s572_s24 = sadd.s32 4294967295, %s856_s23   ;;  %p574_p0 = scmp.ge.s32.totalorder %s856_s23, 1  ;;  %s856_s23 = sphi %s902_s23, %s22_s23   ;;  %s852_s22 = sphi %s900_s22, %s1064_s22   ;;  %s848_s21 = sphi %s898_s21, %s1063_s21   ;;  %s844_s20 = sphi %s896_s20, %s1062_s20   ;;  %s840_s19 = sphi %s894_s19, %s1061_s19   ;;  %s836_s18 = sphi %s892_s18, %s1060_s18  }
   0x8   : > { %p926_p1 = scmp.eq.s32.totalorder %s572_s24, 0  ;;  %p190_p2 = scmp.lt.s32.totalorder %s856_s23, 3 }
   0x9   : > { %s203_s28 = sshll.u32 %s1050_s1, 4  ;;  %s858_s30 = smov [#allocation5]   ;;  %s204_s28 = int_to_ptr.hbm [resolvable:$true] %s203_s28 }
   0xa   : > { %p934_p3 = pnand %p574_p0, %p190_p2  ;;  %s205_s6 = sshll.u32 %s858_s30, 4  ;;  %s206_s6 = int_to_ptr.vmem [resolvable:$true] %s205_s6 }
   0xb   : > { %p578_p6 = scmp.ge.s32.totalorder %s856_s23, 2  ;;  %s226_s9 = sshll.u32 %s1052_s3, 4  ;;  %s227_s9 = int_to_ptr.hbm [resolvable:$true] %s226_s9 }
   0xc   : > { %p603_p4 = pneg %p934_p3  ;;  %s859_s10 = smov 128  }
   0xd   : > { %s860_s11 = smov 8   ;;  %s861_s12 = smov [#allocation7]  }
   0xe   : > { %p604_p5 = pnand %p603_p4, %p926_p1  ;;  %s228_s13 = sshll.u32 %s861_s12, 4  ;;  %s229_s13 = int_to_ptr.vmem [resolvable:$true] %s228_s13 }
   0xf   : > { %s34_s14 = sadd.s32 1, %s852_s22  ;;  %s573_s15 = sadd.s32 4294967294, %s856_s23  }
  0x10   : > { %606 = dma.hbm_to_vmem [thread:$0]  (!%p604_p5), %s204_s28, 2048, %s206_s6, [#allocation6], %s859_s10, %s859_s10, %s860_s11  }
  0x11   : > { %609 = dma.hbm_to_vmem [thread:$0]  (!%p604_p5), %s227_s9, 2048, %s229_s13, [#allocation6], %s859_s10, %s859_s10, %s860_s11  }
  0x12   : > { %p36_p7 = scmp.ge.s32.totalorder %s34_s14, 2  ;;  %s41_s16 = sadd.s32 1, %s844_s20 }
  0x13   : > { %p48_p8 = scmp.ne.s32.totalorder %s844_s20, %s840_s19  ;;  %p49_p9 = scmp.eq.s32.totalorder %s856_s23, 0 }
  0x14   : > { %s1066_s14 = smov (%p36_p7, %s34_s14), 0  ;;  %p54_p10 = scmp.ne.s32.totalorder %s840_s19, %s836_s18 }
  0x15   : > { %s38_s17 = ssub.s32 %s852_s22, %s1066_s14  ;;  %p177_p11 = scmp.eq.s32.totalorder %s572_s24, 1 }
  0x16   : > { %p39_p12 = scmp.eq.s32.totalorder %s38_s17, 0  ;;  %p962_p13 = por %p926_p1, %p54_p10 }
  0x17   : > { %p966_p0 = por %p177_p11, %p48_p8  ;;  %p183_p2 = scmp.eq.s32.totalorder %s573_s15, 1 }
  0x18   : > { %s971_s28 = scalar_select %p39_p12, %s844_s20, %s41_s16  }
  0x19   : > { %p50_p4 = por %p49_p9, %p48_p8  ;;  %p973_p5 = por %p183_p2, %p54_p10 }
  0x1a   : > { %s245_s6 = sand.u32 1, %s844_s20   ;;  %s580_s24 = sshll.u32 %s852_s22, 3 }
  0x1b   : > { %p620_p7 = scmp.lt.s32.totalorder %s856_s23, 2  ;;  %s579_s7 = sshll.u32 %s245_s6, 3 }
  0x1c   : > { %s253_s10 = scalar_lea.hbm %s1049_s0, %s580_s24  ;;  %s249_s12 = scalar_lea.vmem [#allocation2], %s579_s7 }
  0x1d   : > { %s255_s11 = sshll.u32 %s253_s10, 4  ;;  %s257_s13 = sshll.u32 %s249_s12, 4  ;;  %s256_s11 = int_to_ptr.hbm [resolvable:$true] %s255_s11  ;;  %s258_s13 = int_to_ptr.vmem [resolvable:$true] %s257_s13 }
  0x1e   : > { %p611_p11 = pnand %p620_p7, %p50_p4  ;;  %s246_s15 = scalar_lea.sflag [#allocation3], %s245_s6 }
  0x1f   : > { %266 = sbr.rel (%p934_p3) target bundleno = 381 (0x17d), region = 40  ;;  %s986_s16 = sand.u32 (!%p934_p3), 1, %s840_s19  }
  0x20   : > { %613 = dma.hbm_to_vmem [thread:$0]  (!%p611_p11), %s256_s11, 128, %s258_s13, %s246_s15  }
  0x21   : > { %s582_s17 = sshll.u32 (!%p934_p3), %s986_s16, 3  ;;  %s269_s24 = scalar_lea.sflag (!%p934_p3), [#allocation3], %s986_s16 }
  0x22   : > { %s992_s7 = scalar_lea.vmem (!%p934_p3), [#allocation2], %s582_s17 }
  0x24   : > { %823 = dma.done.wait (%p962_p13), %s269_s24, 128  }
  0x25   : > { %825 = vsyncadd (%p962_p13), %s269_s24, 4294967168 }
  0x26   : > { %827 = dma.done.wait (%p926_p1), [#allocation6], 4096  }
  0x27   : > { %829 = vsyncadd (%p926_p1), [#allocation6], 4294963200  ;;  %v333_v0 = vld [vmem:[#allocation5 + $0x78] sm:$0xff]  ;;  %v332_v1 = vld [vmem:[#allocation5 + $0x70] sm:$0xff]  ;;  %s588_s26 = sshll.u32 %s848_s21, 3  ;;  %s312_s12 = scalar_lea.vmem [#allocation8], %s582_s17 }
  0x28   : > { %338 = vmatpush.msra.mxu0 %v333_v0  ;;  %v331_v2 = vld [vmem:[#allocation5 + $0x68] sm:$0xff]  ;;  %v330_v3 = vld [vmem:[#allocation5 + $0x60] sm:$0xff]  ;;  %v329_v4 = vld [vmem:[#allocation5 + $0x58] sm:$0xff]  ;;  %s454_s9 = scalar_lea.hbm %s1054_s5, %s588_s26  ;;  %s456_s13 = sshll.u32 %s312_s12, 4  ;;  %s457_s13 = int_to_ptr.vmem [resolvable:$true] %s456_s13 }
  0x29   : > { %v328_v5 = vld [vmem:[#allocation5 + $0x50] sm:$0xff]  ;;  %v327_v6 = vld [vmem:[#allocation5 + $0x48] sm:$0xff]  ;;  %v326_v7 = vld [vmem:[#allocation5 + $0x40] sm:$0xff]  ;;  %s458_s15 = sshll.u32 %s454_s9, 4  ;;  %s444_s24 = scalar_lea.sflag [#allocation4], %s986_s16  ;;  %s459_s15 = int_to_ptr.hbm [resolvable:$true] %s458_s15 }
  0x2a   : > { %339 = vmatpush.msra.mxu0 %v332_v1  ;;  %v325_v8 = vld [vmem:[#allocation5 + $0x38] sm:$0xff]  ;;  %v324_v9 = vld [vmem:[#allocation5 + $0x30] sm:$0xff]  ;;  %v323_v10 = vld [vmem:[#allocation5 + $0x28] sm:$0xff]  ;;  %s784_s21 = sshra.s32 %s459_s15, 4  ;;  %s790_s26 = scalar_lea.hbm %s1054_s5, 16  ;;  %s785_s21 = int_to_ptr.hbm [resolvable:$true] %s784_s21 }
  0x2b   : > { %v322_v11 = vld [vmem:[#allocation5 + $0x20] sm:$0xff]  ;;  %v321_v12 = vld [vmem:[#allocation5 + $0x18] sm:$0xff]  ;;  %v320_v13 = vld [vmem:[#allocation5 + $0x10] sm:$0xff]  ;;  %p791_p9 = scmp.lt.s32.totalorder %s785_s21, %s1054_s5 }
  0x2c   : > { %340 = vmatpush.msra.mxu0 %v331_v2  ;;  %v319_v14 = vld [vmem:[#allocation5 + $0x8] sm:$0xff]  ;;  %v318_v15 = vld [vmem:[#allocation5] sm:$0xff]  ;;  %v317_v16 = vld [vmem:[%s992_s7] sm:$0xff]  ;;  %s786_s7 = scalar_lea.hbm %s785_s21, 8 }
  0x2d   : > { %v417_v17 = vld [vmem:[#allocation7 + $0x78] sm:$0xff]  ;;  %v416_v18 = vld [vmem:[#allocation7 + $0x70] sm:$0xff]  ;;  %v415_v19 = vld [vmem:[#allocation7 + $0x68] sm:$0xff]  ;;  %p787_p1 = scmp.ne.s32.totalorder %s785_s21, %s786_s7  ;;  %p792_p10 = scmp.lt.s32.totalorder %s790_s26, %s786_s7 }
  0x2e   : > { %341 = vmatpush.msra.mxu0 %v330_v3  ;;  %422 = vmatpush.msra.mxu1 %v417_v17  ;;  %v414_v20 = vld [vmem:[#allocation7 + $0x60] sm:$0xff]  ;;  %v676_v21 = vld [vmem:[%s1051_s2] ss:$0 sm:$0xff]  ;;  %v413_v22 = vld [vmem:[#allocation7 + $0x58] sm:$0xff] }
  0x2f   : > { %v412_v23 = vld [vmem:[#allocation7 + $0x50] sm:$0xff]  ;;  %v411_v25 = vld [vmem:[#allocation7 + $0x48] sm:$0xff]  ;;  %v410_v27 = vld [vmem:[#allocation7 + $0x40] sm:$0xff]  ;;  %p788_p3 = pnand %p787_p1, %p966_p0  ;;  %p793_p12 = por %p792_p10, %p791_p9 }
  0x30   : > { %342 = vmatpush.msra.mxu0 %v329_v4  ;;  %423 = vmatpush.msra.mxu1 %v416_v18  ;;  %v409_v29 = vld [vmem:[#allocation7 + $0x38] sm:$0xff]  ;;  %v408_v31 = vld [vmem:[#allocation7 + $0x30] sm:$0xff]  ;;  %v407_v33 = vld [vmem:[#allocation7 + $0x28] sm:$0xff] }
  0x31   : > { %v406_v36 = vld [vmem:[#allocation7 + $0x20] sm:$0xff]  ;;  %v405_v39 = vld [vmem:[#allocation7 + $0x18] sm:$0xff]  ;;  %v404_v42 = vld [vmem:[#allocation7 + $0x10] sm:$0xff]  ;;  %p789_p8 = pneg %p788_p3 }
  0x32   : > { %343 = vmatpush.msra.mxu0 %v328_v5  ;;  %424 = vmatpush.msra.mxu1 %v415_v19  ;;  %v403_v45 = vld [vmem:[#allocation7 + $0x8] sm:$0xff]  ;;  %v402_v47 = vld [vmem:[#allocation7] sm:$0xff] }
  0x33   : > { %p794_p13 = pnand %p793_p12, %p789_p8 }
  0x34   : > { %344 = vmatpush.msra.mxu0 %v327_v6  ;;  %425 = vmatpush.msra.mxu1 %v414_v20 }
  0x36   : > { %345 = vmatpush.msra.mxu0 %v326_v7  ;;  %426 = vmatpush.msra.mxu1 %v413_v22 }
  0x38   : > { %346 = vmatpush.msra.mxu0 %v325_v8  ;;  %427 = vmatpush.msra.mxu1 %v412_v23 }
  0x3a   : > { %347 = vmatpush.msra.mxu0 %v324_v9  ;;  %428 = vmatpush.msra.mxu1 %v411_v25 }
  0x3c   : > { %348 = vmatpush.msra.mxu0 %v323_v10  ;;  %429 = vmatpush.msra.mxu1 %v410_v27 }
  0x3e   : > { %349 = vmatpush.msra.mxu0 %v322_v11  ;;  %430 = vmatpush.msra.mxu1 %v409_v29  ;;  %v677_v11 = vld [vmem:[%s1053_s4] ss:$0 sm:$0xff] }
  0x40   : > { %350 = vmatpush.msra.mxu0 %v321_v12  ;;  %431 = vmatpush.msra.mxu1 %v408_v31 }
  0x42   : > { %351 = vmatpush.msra.mxu0 %v320_v13  ;;  %432 = vmatpush.msra.mxu1 %v407_v33 }
  0x44   : > { %352 = vmatpush.msra.mxu0 %v319_v14  ;;  %433 = vmatpush.msra.mxu1 %v406_v36 }
  0x46   : > { %353 = vmatpush.msra.mxu0 %v318_v15  ;;  %434 = vmatpush.msra.mxu1 %v405_v39 }
  0x47   : > { %354 = vmatmul.f32.vlgmr.msra.gmra.mxu0 %v317_v16 }
  0x48   : > { %435 = vmatpush.msra.mxu1 %v404_v42 }
  0x4a   : > { %436 = vmatpush.msra.mxu1 %v403_v45 }
  0x4c   : > { %437 = vmatpush.msra.mxu1 %v402_v47 }
  0xc4   : > { %v355_v24 = vpop.f32.mrf.mxu0 }
  0xc5   : > { %v356_v26 = vadd.f32 %v676_v21, %v355_v24 }
  0xc7   : > { %v359_v28 = vmul.f32 0.70710677, %v356_v26  ;;  %v358_v8 = vmul.f32 0.5, %v356_v26 }
  0xc9   : > { %v360_v30 = vmul.f32 %v359_v28, %v359_v28 }
  0xcb   : > { %v361_v32 = vmin.f32 %v360_v30, 16.0 }
  0xcd   : > { %v362_v34 = vmul.f32 2.1237322e-06, %v361_v32  ;;  %v373_v35 = vmul.f32 3.8918573e-05, %v361_v32 }
  0xcf   : > { %v363_v37 = vadd.f32 0.00028619796, %v362_v34  ;;  %v374_v38 = vadd.f32 0.001143296, %v373_v35 }
  0xd1   : > { %v364_v40 = vmul.f32 %v363_v37, %v361_v32  ;;  %v375_v41 = vmul.f32 %v374_v38, %v361_v32 }
  0xd3   : > { %v376_v43 = vadd.f32 0.014752088, %v375_v41  ;;  %v365_v44 = vadd.f32 0.0036580483, %v364_v40 }
  0xd5   : > { %v377_v46 = vmul.f32 %v376_v43, %v361_v32  ;;  %v366_v49 = vmul.f32 %v365_v44, %v361_v32 }
  0xd7   : > { %v378_v48 = vadd.f32 0.112945676, %v377_v46  ;;  %v367_v52 = vadd.f32 0.05243302, %v366_v49 }
  0xd9   : > { %v379_v50 = vmul.f32 %v378_v48, %v361_v32  ;;  %v368_v55 = vmul.f32 %v367_v52, %v361_v32 }
  0xdb   : > { %v380_v51 = vadd.f32 0.4994258, %v379_v50  ;;  %v369_v56 = vadd.f32 0.18741608, %v368_v55 }
  0xdd   : > { %v381_v53 = vmul.f32 %v380_v51, %v361_v32  ;;  %v370_v58 = vmul.f32 %v369_v56, %v361_v32 }
  0xdf   : > { %v382_v54 = vadd.f32 1.0, %v381_v53  ;;  %v371_v62 = vadd.f32 1.1283791, %v370_v58 }
  0xe1   : > { %678 = vrcp.f32 %v382_v54  ;;  %v394_v61 = vand.u32 2147483648, %v382_v54  ;;  %v392_v0 = vand.u32 2147483647, %v382_v54  ;;  %vm388_vm1 = vweird.f32 %v382_v54 }
  0xe2   : > { %v372_v3 = vmul.f32 %v371_v62, %v359_v28 }
  0xe3   : > { %v395_v2 = vor.u32 1.1754944e-38, %v394_v61  ;;  %vm393_vm3 = vcmp.eq.f32.partialorder %v392_v0, 8.507059e+37 }
  0xe7   : > { %v679_v57 = vpop.eup %678 }
  0xe8   : > { %v384_v59 = vmul.f32 %v679_v57, %v382_v54  ;;  %vm389_vm0 = vweird.f32 %v679_v57 }
  0xe9   : > { %vm390_vm2 = vmor %vm388_vm1, %vm389_vm0 }
  0xea   : > { %v385_v60 = vsub.f32 1.0, %v384_v59 }
  0xec   : > { %v386_v63 = vmul.f32 %v679_v57, %v385_v60 }
  0xee   : > { %v387_v1 = vadd.f32 %v679_v57, %v386_v63 }
  0xf0   : > { %v391_v4 = vsel %vm390_vm2, %v679_v57, %v387_v1 }
  0xf1   : > { %v396_v5 = vsel %vm393_vm3, %v395_v2, %v391_v4 }
  0xf2   : > { %v397_v6 = vmul.f32 %v396_v5, %v372_v3 }
  0xf4   : > { %v586_v7 = vclamps-f32 %v397_v6, 1.0 }
  0xf6   : > { %v400_v9 = vadd.f32 1.0, %v586_v7 }
  0xf8   : > { %v401_v10 = vmul.f32 %v400_v9, %v358_v8 }
  0xfa   : > { %438 = vmatmul.f32.vlgmr.msra.gmra.mxu1 %v401_v10 }
 0x177   : > { %v439_v12 = vpop.f32.mrf.mxu1 }
 0x178   : > { %v440_v13 = vadd.f32 %v677_v11, %v439_v12 }
 0x17a   : > { %442 = vst [vmem:[%s312_s12] sm:$0xff] %v440_v13 }
 0x17b   : > { %797 = shalt.err (!%p794_p13)
}
 0x17c   : > { %601 = dma.vmem_to_hbm [thread:$0]  (%p966_p0), %s457_s13, 128, %s459_s15, %s444_s24  }
 0x17d PF: > { %s470_s16 = sand.u32 1, %s836_s18   ;;  %p615_p2 = pnand %p578_p6, %p973_p5 }
 0x17e   : > { %s471_s8 = scalar_lea.sflag [#allocation4], %s470_s16 }
 0x17f   : > { %p616_p4 = pneg %p615_p2 }
 0x181   : > { %831 = dma.done.wait (%p616_p4), %s471_s8, 128  }
 0x182   : > { %833 = vsyncadd (%p616_p4), %s471_s8, 4294967168  ;;  %s22_s23 = sadd.s32 1, %s856_s23   ;;  %s1060_s18 = smov %s840_s19 }
 0x183   : > { %p19_p7 = scmp.ge.s32.totalorder %s22_s23, 4   ;;  %s1061_s19 = smov %s844_s20 }
 0x184   : > { %s1062_s20 = smov %s971_s28  ;;  %s1063_s21 = smov %s852_s22 }
 0x185   : > { %s1064_s22 = smov %s1066_s14  ;;  %21 = sbr.rel (!%p19_p7) target bundleno = 7 (0x7), region = 98 }
 0x18a   :  { %477 = vsyncpa [#allocation3], 1 }
 0x18b   :  { %479 = vsyncpa [#allocation3 + $0x1], 1 }
 0x18c   :  { %480 = vsyncpa [#allocation6], 1 }
 0x18d   :  { %481 = vsyncpa [#allocation4], 1 }
 0x18e   :  { %483 = vsyncpa [#allocation4 + $0x1], 1 }

</bundles_post_ra>
